<compile_context>
chip_gen: v7x
topology: tpu7x:2x2x1
jax: 0.10.0
libtpu: 0.0.40
codegen_flags: <defaults>
</compile_context>

<pallas_src>
import jax
import jax.numpy as jnp
from jax import lax
from jax.experimental import pallas as pl
from jax.experimental.pallas import tpu as pltpu


def _round_up(x, m):
    return ((x + m - 1) // m) * m


def _sublane_pack(dtype):
    # Minimum second-minor (sublane) packing for a given element width:
    # 8 for 4-byte, 16 for 2-byte (bf16), 32 for 1-byte dtypes.
    return max(8, 32 // jnp.dtype(dtype).itemsize)


def _vmem_capacity_bytes():
    try:
        cap = int(pltpu.get_tpu_info().vmem_capacity_bytes)
        if cap > 0:
            return cap
    except Exception:
        pass
    return 64 << 20  # v7x-safe fallback


def _decoder_kernel(x_ref, w_ref, o_ref):
    # x_ref: (tm, K) hidden tile; w_ref: (tn, K) native-layout weight tile.
    # Contract both last dims (A @ B^T) -> MXU native, no transpose.
    o_ref[...] = lax.dot_general(
        x_ref[...], w_ref[...],
        dimension_numbers=(((1,), (1,)), ((), ())),
        preferred_element_type=jnp.float32,
    ).astype(o_ref.dtype)


def _decoder_kernel_kacc(x_ref, w_ref, o_ref, acc_ref):
    # K-tiled variant: f32 accumulator, init at k==0, flush at k==last.
    k = pl.program_id(2)

    @pl.when(k == 0)
    def _():
        acc_ref[...] = jnp.zeros_like(acc_ref)

    acc_ref[...] += lax.dot_general(
        x_ref[...], w_ref[...],
        dimension_numbers=(((1,), (1,)), ((), ())),
        preferred_element_type=jnp.float32,
    )

    @pl.when(k == pl.num_programs(2) - 1)
    def _():
        o_ref[...] = acc_ref[...].astype(o_ref.dtype)


def classification_block(hidden_state, embed_weights, *,
                         tm=256, tn=1024,
                         compute_dtype=jnp.bfloat16,
                         out_dtype=None,
                         k_tile=None):
    """lm_logits = hidden_state @ embed_weights.T via a Pallas TPU kernel."""
    B, S, K = hidden_state.shape
    V, K_w = embed_weights.shape
    assert K == K_w, "embed dim mismatch"

    if compute_dtype is None:
        compute_dtype = hidden_state.dtype
    if out_dtype is None:
        out_dtype = hidden_state.dtype

    M = B * S
    in_bytes = jnp.dtype(compute_dtype).itemsize
    out_bytes = jnp.dtype(out_dtype).itemsize

    # Tile sizes, aligned to hardware and clamped for small problems.
    pack = _sublane_pack(compute_dtype)
    tm_eff = _round_up(min(tm, _round_up(M, pack)), pack)
    tn_eff = _round_up(min(tn, _round_up(V, 128)), 128)

    # Generation-aware VMEM budget (~25% headroom on physical capacity).
    budget = (_vmem_capacity_bytes() * 3) // 4

    def working_set(tk, k_tiled):
        ws = 2 * (tm_eff * tk + tn_eff * tk) * in_bytes   # double-buffered inputs
        ws += 2 * tm_eff * tn_eff * out_bytes             # double-buffered output
        if k_tiled:
            ws += tm_eff * tn_eff * 4                     # f32 accumulator scratch
        return ws

    # Decide on K tiling: prefer K whole (weight streamed exactly once); fall
    # back to K tiles only if the un-tiled working set would not fit, or if
    # explicitly forced.  K tiles must divide K exactly (keeps edge-block
    # garbage out of valid outputs).
    if k_tile is not None and 0 < k_tile < K and K % k_tile == 0:
        tk_eff, k_tiled = k_tile, True
    else:
        tk_eff, k_tiled = K, False
        if working_set(K, False) > budget:
            for cand in (2048, 1024, 512, 256):
                if K > cand and K % cand == 0 and working_set(cand, True) <= budget:
                    tk_eff, k_tiled = cand, True
                    break
    # Last resort: shrink the vocab tile (stay lane-dense, >= 256).
    while working_set(tk_eff, k_tiled) > budget and tn_eff > 256:
        tn_eff = max(256, tn_eff // 2)

    vmem_limit = int(min(budget,
                         max(working_set(tk_eff, k_tiled) + (4 << 20), 32 << 20)))

    # Single dtype cast only (no transpose, no pad).  In a real model the
    # compute-dtype copy of the tied embedding would be cached at init.
    x2d = hidden_state.reshape(M, K)
    if x2d.dtype != compute_dtype:
        x2d = x2d.astype(compute_dtype)
    w = embed_weights
    if w.dtype != compute_dtype:
        w = w.astype(compute_dtype)

    v_tiles = pl.cdiv(V, tn_eff)
    m_tiles = pl.cdiv(M, tm_eff)

    # Real traffic: hidden re-read once per vocab tile; weight read once
    # (or once per M tile in the K-tiled fallback); logits written once.
    cost = pl.CostEstimate(
        flops=2 * M * V * K,
        transcendentals=0,
        bytes_accessed=(M * K * in_bytes * v_tiles
                        + V * K * in_bytes * (m_tiles if k_tiled else 1)
                        + M * V * out_bytes),
    )

    out_shape = jax.ShapeDtypeStruct((M, V), out_dtype)

    if not k_tiled:
        out2d = pl.pallas_call(
            _decoder_kernel,
            out_shape=out_shape,
            grid_spec=pltpu.PrefetchScalarGridSpec(
                num_scalar_prefetch=0,
                grid=(v_tiles, m_tiles),
                in_specs=[
                    pl.BlockSpec((tm_eff, K), lambda j, i: (i, 0)),   # hidden
                    pl.BlockSpec((tn_eff, K), lambda j, i: (j, 0)),   # weight (V,K)
                ],
                out_specs=pl.BlockSpec((tm_eff, tn_eff), lambda j, i: (i, j)),
            ),
            compiler_params=pltpu.CompilerParams(
                dimension_semantics=("parallel", "arbitrary"),
                vmem_limit_bytes=vmem_limit,
            ),
            cost_estimate=cost,
        )(x2d, w)
    else:
        out2d = pl.pallas_call(
            _decoder_kernel_kacc,
            out_shape=out_shape,
            grid_spec=pltpu.PrefetchScalarGridSpec(
                num_scalar_prefetch=0,
                grid=(v_tiles, m_tiles, K // tk_eff),
                in_specs=[
                    pl.BlockSpec((tm_eff, tk_eff), lambda j, i, k: (i, k)),
                    pl.BlockSpec((tn_eff, tk_eff), lambda j, i, k: (j, k)),
                ],
                out_specs=pl.BlockSpec((tm_eff, tn_eff), lambda j, i, k: (i, j)),
                scratch_shapes=[pltpu.VMEM((tm_eff, tn_eff), jnp.float32)],
            ),
            compiler_params=pltpu.CompilerParams(
                dimension_semantics=("parallel", "arbitrary", "arbitrary"),
                vmem_limit_bytes=vmem_limit,
            ),
            cost_estimate=cost,
        )(x2d, w)

    return out2d.reshape(B, S, V)


if __name__ == "__main__":
    # Small, deterministic shapes consistent with the module.  Vocab is
    # deliberately NOT a multiple of the tile to exercise masked edge blocks.
    batch, seq, embed_dim, vocab = 2, 8, 32, 1000

    key = jax.random.PRNGKey(0)
    k_w, k_h, k_w2, k_h2 = jax.random.split(key, 4)
    embed_weights = jax.random.normal(k_w, (vocab, embed_dim), dtype=jnp.float32)
    hidden_state = jax.random.normal(k_h, (batch, seq, embed_dim), dtype=jnp.float32)

    ref = jnp.einsum("bsk,vk->bsv", hidden_state, embed_weights)

    # f32 compute path (near-exact nn.Linear numerics; accumulation order
    # differs from PyTorch so tolerance-level, not bit-exact).
    logits_f32 = classification_block(hidden_state, embed_weights,
                                      compute_dtype=jnp.float32)
    jax.block_until_ready(logits_f32)
    assert logits_f32.shape == (batch, seq, vocab)
    assert jnp.allclose(logits_f32, ref, atol=1e-4, rtol=1e-5)

    # Default fast path: bf16 MXU inputs, f32 accumulation, f32 logits.
    logits_bf16 = classification_block(hidden_state, embed_weights)
    jax.block_until_ready(logits_bf16)
    assert logits_bf16.shape == (batch, seq, vocab)
    assert jnp.allclose(logits_bf16, ref, atol=0.3, rtol=0.05)

    # Exercise the K-tiled accumulator path (forced; exact tile divisors).
    embed_dim2, vocab2 = 256, 512
    w2 = jax.random.normal(k_w2, (vocab2, embed_dim2), dtype=jnp.float32)
    h2 = jax.random.normal(k_h2, (batch, seq, embed_dim2), dtype=jnp.float32)
    ref2 = jnp.einsum("bsk,vk->bsv", h2, w2)
    logits_k = classification_block(h2, w2, compute_dtype=jnp.float32, k_tile=128)
    jax.block_until_ready(logits_k)
    assert logits_k.shape == (batch, seq, vocab2)
    assert jnp.allclose(logits_k, ref2, atol=1e-3, rtol=1e-5)

    print("KERNEL_OK")
</pallas_src>

<mosaic_0001>
module attributes {stable_mosaic.version = 11 : i64} {
  func.func @_decoder_kernel(%arg0: i32, %arg1: i32, %arg2: memref<16x32xf32, #tpu.memory_space<vmem>>, %arg3: memref<1024x32xf32, #tpu.memory_space<vmem>>, %arg4: memref<16x1024xf32, #tpu.memory_space<vmem>>) attributes {dimension_semantics = [#tpu.dimension_semantics<parallel>, #tpu.dimension_semantics<arbitrary>], iteration_bounds = array<i64: 1, 1>, scalar_prefetch = 0 : i64, scratch_operands = 0 : i64, tpu.core_type = #tpu.core_type<tc>, window_params = [{transform_indices = @transform_0, window_bounds = array<i64: 16, 32>}, {transform_indices = @transform_1, window_bounds = array<i64: 1024, 32>}, {transform_indices = @transform_2, window_bounds = array<i64: 16, 1024>}]} {
    %c0 = arith.constant 0 : index
    %c0_0 = arith.constant 0 : index
    %0 = vector.load %arg2[%c0, %c0_0] : memref<16x32xf32, #tpu.memory_space<vmem>>, vector<16x32xf32>
    %c0_1 = arith.constant 0 : index
    %c0_2 = arith.constant 0 : index
    %1 = vector.load %arg3[%c0_1, %c0_2] : memref<1024x32xf32, #tpu.memory_space<vmem>>, vector<1024x32xf32>
    %cst = arith.constant dense<0.000000e+00> : vector<16x1024xf32>
    %2 = tpu.matmul %0, %1, %cst {dimension_numbers = #tpu.dot_dimension_numbers<[1], [1], [0], [0], [0, 0, 1, 0], [], []>} : vector<16x32xf32>, vector<1024x32xf32>, vector<16x1024xf32> -> vector<16x1024xf32>
    %c0_3 = arith.constant 0 : index
    %c0_4 = arith.constant 0 : index
    %3 = vector.load %arg4[%c0_3, %c0_4] : memref<16x1024xf32, #tpu.memory_space<vmem>>, vector<16x1024xf32>
    tpu.vector_store %arg4[%c0_3, %c0_4], %2 {strides = array<i32>} : memref<16x1024xf32, #tpu.memory_space<vmem>>, vector<16x1024xf32>,
    return
  }
  func.func @transform_0(%arg0: i32, %arg1: i32) -> (i32, i32) {
    %c0_i32 = arith.constant 0 : i32
    %c0_i32_0 = arith.constant 0 : i32
    return %arg1, %c0_i32 : i32, i32
  }
  func.func @transform_1(%arg0: i32, %arg1: i32) -> (i32, i32) {
    %c0_i32 = arith.constant 0 : i32
    %c0_i32_0 = arith.constant 0 : i32
    return %arg0, %c0_i32 : i32, i32
  }
  func.func @transform_2(%arg0: i32, %arg1: i32) -> (i32, i32) {
    %c0_i32 = arith.constant 0 : i32
    return %arg1, %arg0 : i32, i32
  }
}

</mosaic_0001>

<bundles_post_ra>
// kernel: tpu_custom_call.1
= control target key start
LH: loop header
LB: loop body
LE: loop exit
PB: predicated region body
PF: predicated region fallthrough
CT: control target
= control target key end

     0   :  { %vm142_vm0 = vcmask 261120   ;;  %s1962_s0 = inlined_call_operand.vmem [shape: f32[16,32], index: 0, kind: input, shape index: {}]   ;;  %s1963_s1 = inlined_call_operand.vmem [shape: f32[1000,32], index: 1, kind: input, shape index: {}]   ;;  %s1964_s2 = inlined_call_operand.hbm [shape: f32[16,1000], index: 2, kind: output, shape index: {}]  }
   0x1   :  { %v30_v0 = vld [vmem:[%s1963_s1 + $0x80] sm:$0xff]  ;;  %v31_v1 = vld [vmem:[%s1963_s1 + $0x88] sm:$0xff]  ;;  %vm1401_vm1 = vmpackc.low %vm142_vm0, %vm142_vm0 }
   0x2   :  { %v62_v2 = vld [vmem:[%s1963_s1 + $0x180] sm:$0xff]  ;;  %v1153_v3 = vpack.c.bf16 %v31_v1, %v30_v0  ;;  %v63_v5 = vld [vmem:[%s1963_s1 + $0x188] sm:$0xff]  ;;  %v32_v13 = vld [vmem:[%s1963_s1 + $0x90] sm:$0xff] }
   0x3   :  { %v14_v6 = vld [vmem:[%s1963_s1] sm:$0xff]  ;;  %v1201_v7 = vpack.c.bf16 %v63_v5, %v62_v2  ;;  %v15_v8 = vld [vmem:[%s1963_s1 + $0x8] sm:$0xff]  ;;  %v33_v14 = vld [vmem:[%s1963_s1 + $0x98] sm:$0xff] }
   0x4   :  { %v46_v9 = vld [vmem:[%s1963_s1 + $0x100] sm:$0xff]  ;;  %v47_v10 = vld [vmem:[%s1963_s1 + $0x108] sm:$0xff]  ;;  %1155 = vmatprep.subr.msk.bf16.mxu0 %vm1401_vm1, %v1153_v3  ;;  %v1156_v11 = vpack.c.bf16 %v15_v8, %v14_v6  ;;  %v64_v15 = vld [vmem:[%s1963_s1 + $0x190] sm:$0xff]  ;;  %v1159_v16 = vpack.c.bf16 %v33_v14, %v32_v13 }
   0x5   :  { %v1204_v12 = vpack.c.bf16 %v47_v10, %v46_v9  ;;  %1203 = vmatprep.subr.msk.bf16.mxu1 %vm1401_vm1, %v1201_v7  ;;  %v65_v17 = vld [vmem:[%s1963_s1 + $0x198] sm:$0xff]  ;;  %v16_v19 = vld [vmem:[%s1963_s1 + $0x10] sm:$0xff]  ;;  %v34_v23 = vld [vmem:[%s1963_s1 + $0xa0] sm:$0xff] }
   0x6   :  { %1158 = vmatpush3.bf16.xpose.msk.msra.mxu0 %vm1401_vm1, %v1156_v11  ;;  %v1207_v18 = vpack.c.bf16 %v65_v17, %v64_v15  ;;  %v17_v20 = vld [vmem:[%s1963_s1 + $0x18] sm:$0xff]  ;;  %v48_v21 = vld [vmem:[%s1963_s1 + $0x110] sm:$0xff]  ;;  %v35_v24 = vld [vmem:[%s1963_s1 + $0xa8] sm:$0xff] }
   0x7   :  { %1206 = vmatpush3.bf16.xpose.msk.msra.mxu1 %vm1401_vm1, %v1204_v12  ;;  %1161 = vmatprep.subr.msk.bf16.mxu0 %vm1401_vm1, %v1159_v16  ;;  %v49_v22 = vld [vmem:[%s1963_s1 + $0x118] sm:$0xff]  ;;  %v66_v25 = vld [vmem:[%s1963_s1 + $0x1a0] sm:$0xff]  ;;  %v67_v26 = vld [vmem:[%s1963_s1 + $0x1a8] sm:$0xff]  ;;  %v1162_v27 = vpack.c.bf16 %v17_v20, %v16_v19  ;;  %v1165_v29 = vpack.c.bf16 %v35_v24, %v34_v23 }
   0x8   :  { %1209 = vmatprep.subr.msk.bf16.mxu1 %vm1401_vm1, %v1207_v18  ;;  %v1210_v28 = vpack.c.bf16 %v49_v22, %v48_v21  ;;  %v1213_v30 = vpack.c.bf16 %v67_v26, %v66_v25  ;;  %v18_v31 = vld [vmem:[%s1963_s1 + $0x20] sm:$0xff]  ;;  %v19_v32 = vld [vmem:[%s1963_s1 + $0x28] sm:$0xff]  ;;  %v36_v35 = vld [vmem:[%s1963_s1 + $0xb0] sm:$0xff] }
   0x9   :  { %v50_v33 = vld [vmem:[%s1963_s1 + $0x120] sm:$0xff]  ;;  %v51_v34 = vld [vmem:[%s1963_s1 + $0x128] sm:$0xff]  ;;  %v37_v36 = vld [vmem:[%s1963_s1 + $0xb8] sm:$0xff]  ;;  %v1168_v39 = vpack.c.bf16 %v19_v32, %v18_v31 }
   0xa   :  { %v68_v37 = vld [vmem:[%s1963_s1 + $0x1b0] sm:$0xff]  ;;  %v69_v38 = vld [vmem:[%s1963_s1 + $0x1b8] sm:$0xff]  ;;  %v1216_v40 = vpack.c.bf16 %v51_v34, %v50_v33  ;;  %v1171_v41 = vpack.c.bf16 %v37_v36, %v36_v35  ;;  %v1513_v45 = vld [vmem:[%s1962_s0] sm:$0xff] }
   0xb   :  { %v1219_v42 = vpack.c.bf16 %v69_v38, %v68_v37  ;;  %v20_v43 = vld [vmem:[%s1963_s1 + $0x30] sm:$0xff]  ;;  %v21_v44 = vld [vmem:[%s1963_s1 + $0x38] sm:$0xff]  ;;  %v38_v48 = vld [vmem:[%s1963_s1 + $0xc0] sm:$0xff]  ;;  %1041 = vmatprep.mubr.msk.f32.mxu0 %vm142_vm0, %v1513_v45  ;;  %1077 = vmatprep.mubr.msk.f32.mxu1 %vm142_vm0, %v1513_v45 }
   0xc   :  { %v52_v46 = vld [vmem:[%s1963_s1 + $0x130] sm:$0xff]  ;;  %v53_v47 = vld [vmem:[%s1963_s1 + $0x138] sm:$0xff]  ;;  %v39_v49 = vld [vmem:[%s1963_s1 + $0xc8] sm:$0xff]  ;;  %v1174_v52 = vpack.c.bf16 %v21_v44, %v20_v43 }
   0xd   :  { %v70_v50 = vld [vmem:[%s1963_s1 + $0x1c0] sm:$0xff]  ;;  %v71_v51 = vld [vmem:[%s1963_s1 + $0x1c8] sm:$0xff]  ;;  %v1222_v53 = vpack.c.bf16 %v53_v47, %v52_v46  ;;  %v1177_v54 = vpack.c.bf16 %v39_v49, %v38_v48  ;;  %v40_v60 = vld [vmem:[%s1963_s1 + $0xd0] sm:$0xff] }
   0xe   :  { %1164 = vmatpush3.bf16.xpose.msk.msra.mxu0 %vm1401_vm1, %v1162_v27  ;;  %v1225_v55 = vpack.c.bf16 %v71_v51, %v70_v50  ;;  %v22_v56 = vld [vmem:[%s1963_s1 + $0x40] sm:$0xff]  ;;  %v23_v57 = vld [vmem:[%s1963_s1 + $0x48] sm:$0xff]  ;;  %v41_v61 = vld [vmem:[%s1963_s1 + $0xd8] sm:$0xff] }
   0xf   :  { %1212 = vmatpush3.bf16.xpose.msk.msra.mxu1 %vm1401_vm1, %v1210_v28  ;;  %1167 = vmatprep.subr.msk.bf16.mxu0 %vm1401_vm1, %v1165_v29  ;;  %v54_v58 = vld [vmem:[%s1963_s1 + $0x140] sm:$0xff]  ;;  %v55_v59 = vld [vmem:[%s1963_s1 + $0x148] sm:$0xff]  ;;  %v72_v62 = vld [vmem:[%s1963_s1 + $0x1d0] sm:$0xff]  ;;  %v1180_v0 = vpack.c.bf16 %v23_v57, %v22_v56  ;;  %v1183_v2 = vpack.c.bf16 %v41_v61, %v40_v60 }
  0x10   :  { %1215 = vmatprep.subr.msk.bf16.mxu1 %vm1401_vm1, %v1213_v30  ;;  %v73_v63 = vld [vmem:[%s1963_s1 + $0x1d8] sm:$0xff]  ;;  %v1228_v1 = vpack.c.bf16 %v55_v59, %v54_v58  ;;  %v24_v5 = vld [vmem:[%s1963_s1 + $0x50] sm:$0xff]  ;;  %v42_v9 = vld [vmem:[%s1963_s1 + $0xe0] sm:$0xff] }
  0x11   :  { %v1231_v3 = vpack.c.bf16 %v73_v63, %v72_v62  ;;  %v25_v6 = vld [vmem:[%s1963_s1 + $0x58] sm:$0xff]  ;;  %v56_v7 = vld [vmem:[%s1963_s1 + $0x150] sm:$0xff]  ;;  %v43_v10 = vld [vmem:[%s1963_s1 + $0xe8] sm:$0xff] }
  0x12   :  { %v57_v8 = vld [vmem:[%s1963_s1 + $0x158] sm:$0xff]  ;;  %v74_v11 = vld [vmem:[%s1963_s1 + $0x1e0] sm:$0xff]  ;;  %v75_v12 = vld [vmem:[%s1963_s1 + $0x1e8] sm:$0xff]  ;;  %v1186_v13 = vpack.c.bf16 %v25_v6, %v24_v5  ;;  %v1189_v15 = vpack.c.bf16 %v43_v10, %v42_v9 }
  0x13   :  { %v1234_v14 = vpack.c.bf16 %v57_v8, %v56_v7  ;;  %v1237_v16 = vpack.c.bf16 %v75_v12, %v74_v11 }
  0x16   :  { %1170 = vmatpush3.bf16.xpose.msk.msra.mxu0 %vm1401_vm1, %v1168_v39 }
  0x17   :  { %1218 = vmatpush3.bf16.xpose.msk.msra.mxu1 %vm1401_vm1, %v1216_v40  ;;  %1173 = vmatprep.subr.msk.bf16.mxu0 %vm1401_vm1, %v1171_v41 }
  0x18   :  { %1221 = vmatprep.subr.msk.bf16.mxu1 %vm1401_vm1, %v1219_v42 }
  0x1e   :  { %1176 = vmatpush3.bf16.xpose.msk.msra.mxu0 %vm1401_vm1, %v1174_v52 }
  0x1f   :  { %1224 = vmatpush3.bf16.xpose.msk.msra.mxu1 %vm1401_vm1, %v1222_v53  ;;  %1179 = vmatprep.subr.msk.bf16.mxu0 %vm1401_vm1, %v1177_v54 }
  0x20   :  { %1227 = vmatprep.subr.msk.bf16.mxu1 %vm1401_vm1, %v1225_v55 }
  0x26   :  { %1182 = vmatpush3.bf16.xpose.msk.msra.mxu0 %vm1401_vm1, %v1180_v0 }
  0x27   :  { %1230 = vmatpush3.bf16.xpose.msk.msra.mxu1 %vm1401_vm1, %v1228_v1  ;;  %1185 = vmatprep.subr.msk.bf16.mxu0 %vm1401_vm1, %v1183_v2 }
  0x28   :  { %1233 = vmatprep.subr.msk.bf16.mxu1 %vm1401_vm1, %v1231_v3 }
  0x29   :  { %7 = vsyncpa [#allocation3], 0  ;;  %v26_v17 = vld [vmem:[%s1963_s1 + $0x60] sm:$0xff]  ;;  %v27_v18 = vld [vmem:[%s1963_s1 + $0x68] sm:$0xff] }
  0x2a   :  { %v58_v19 = vld [vmem:[%s1963_s1 + $0x160] sm:$0xff]  ;;  %v59_v20 = vld [vmem:[%s1963_s1 + $0x168] sm:$0xff]  ;;  %v44_v21 = vld [vmem:[%s1963_s1 + $0xf0] sm:$0xff]  ;;  %v1192_v25 = vpack.c.bf16 %v27_v18, %v26_v17 }
  0x2b   :  { %v45_v22 = vld [vmem:[%s1963_s1 + $0xf8] sm:$0xff]  ;;  %v76_v23 = vld [vmem:[%s1963_s1 + $0x1f0] sm:$0xff]  ;;  %v1240_v26 = vpack.c.bf16 %v59_v20, %v58_v19  ;;  %v94_v33 = vld [vmem:[%s1963_s1 + $0x280] sm:$0xff] }
  0x2c   :  { %v77_v24 = vld [vmem:[%s1963_s1 + $0x1f8] sm:$0xff]  ;;  %v1195_v27 = vpack.c.bf16 %v45_v22, %v44_v21  ;;  %v28_v29 = vld [vmem:[%s1963_s1 + $0x70] sm:$0xff]  ;;  %v95_v34 = vld [vmem:[%s1963_s1 + $0x288] sm:$0xff] }
  0x2d   :  { %v1243_v28 = vpack.c.bf16 %v77_v24, %v76_v23  ;;  %v29_v30 = vld [vmem:[%s1963_s1 + $0x78] sm:$0xff]  ;;  %v60_v31 = vld [vmem:[%s1963_s1 + $0x170] sm:$0xff]  ;;  %v126_v35 = vld [vmem:[%s1963_s1 + $0x380] sm:$0xff]  ;;  %v1249_v39 = vpack.c.bf16 %v95_v34, %v94_v33 }
  0x2e   :  { %1188 = vmatpush3.bf16.xpose.msk.msra.mxu0 %vm1401_vm1, %v1186_v13  ;;  %v61_v32 = vld [vmem:[%s1963_s1 + $0x178] sm:$0xff]  ;;  %v127_v36 = vld [vmem:[%s1963_s1 + $0x388] sm:$0xff]  ;;  %v1198_v37 = vpack.c.bf16 %v29_v30, %v28_v29  ;;  %v78_v41 = vld [vmem:[%s1963_s1 + $0x200] sm:$0xff] }
  0x2f   :  { %1236 = vmatpush3.bf16.xpose.msk.msra.mxu1 %vm1401_vm1, %v1234_v14  ;;  %1191 = vmatprep.subr.msk.bf16.mxu0 %vm1401_vm1, %v1189_v15  ;;  %v1246_v38 = vpack.c.bf16 %v61_v32, %v60_v31  ;;  %v1297_v40 = vpack.c.bf16 %v127_v36, %v126_v35  ;;  %v79_v42 = vld [vmem:[%s1963_s1 + $0x208] sm:$0xff]  ;;  %v110_v43 = vld [vmem:[%s1963_s1 + $0x300] sm:$0xff]  ;;  %v96_v46 = vld [vmem:[%s1963_s1 + $0x290] sm:$0xff] }
  0x30   :  { %1239 = vmatprep.subr.msk.bf16.mxu1 %vm1401_vm1, %v1237_v16  ;;  %v111_v44 = vld [vmem:[%s1963_s1 + $0x308] sm:$0xff]  ;;  %v97_v47 = vld [vmem:[%s1963_s1 + $0x298] sm:$0xff]  ;;  %v128_v48 = vld [vmem:[%s1963_s1 + $0x390] sm:$0xff]  ;;  %v1252_v50 = vpack.c.bf16 %v79_v42, %v78_v41 }
  0x31   :  { %v129_v49 = vld [vmem:[%s1963_s1 + $0x398] sm:$0xff]  ;;  %v1300_v51 = vpack.c.bf16 %v111_v44, %v110_v43  ;;  %v1255_v52 = vpack.c.bf16 %v97_v47, %v96_v46  ;;  %v1708_v54 = vld [vmem:[%s1962_s0 + $0x8] sm:$0xff]  ;;  %v80_v55 = vld [vmem:[%s1963_s1 + $0x210] sm:$0xff] }
  0x32   :  { %v1303_v53 = vpack.c.bf16 %v129_v49, %v128_v48  ;;  %v81_v56 = vld [vmem:[%s1963_s1 + $0x218] sm:$0xff]  ;;  %v112_v57 = vld [vmem:[%s1963_s1 + $0x310] sm:$0xff]  ;;  %v98_v59 = vld [vmem:[%s1963_s1 + $0x2a0] sm:$0xff] }
  0x33   :  { %v113_v58 = vld [vmem:[%s1963_s1 + $0x318] sm:$0xff]  ;;  %v99_v60 = vld [vmem:[%s1963_s1 + $0x2a8] sm:$0xff]  ;;  %v130_v61 = vld [vmem:[%s1963_s1 + $0x3a0] sm:$0xff]  ;;  %v1258_v63 = vpack.c.bf16 %v81_v56, %v80_v55 }
  0x34   :  { %v131_v62 = vld [vmem:[%s1963_s1 + $0x3a8] sm:$0xff]  ;;  %v1306_v0 = vpack.c.bf16 %v113_v58, %v112_v57  ;;  %v1261_v1 = vpack.c.bf16 %v99_v60, %v98_v59  ;;  %v82_v3 = vld [vmem:[%s1963_s1 + $0x220] sm:$0xff]  ;;  %v100_v8 = vld [vmem:[%s1963_s1 + $0x2b0] sm:$0xff] }
  0x35   :  { %v1309_v2 = vpack.c.bf16 %v131_v62, %v130_v61  ;;  %v83_v5 = vld [vmem:[%s1963_s1 + $0x228] sm:$0xff]  ;;  %v114_v6 = vld [vmem:[%s1963_s1 + $0x320] sm:$0xff]  ;;  %v101_v9 = vld [vmem:[%s1963_s1 + $0x2b8] sm:$0xff] }
  0x36   :  { %1194 = vmatpush3.bf16.xpose.msk.msra.mxu0 %vm1401_vm1, %v1192_v25  ;;  %v115_v7 = vld [vmem:[%s1963_s1 + $0x328] sm:$0xff]  ;;  %v132_v10 = vld [vmem:[%s1963_s1 + $0x3b0] sm:$0xff]  ;;  %v133_v11 = vld [vmem:[%s1963_s1 + $0x3b8] sm:$0xff]  ;;  %v1264_v12 = vpack.c.bf16 %v83_v5, %v82_v3  ;;  %v1267_v14 = vpack.c.bf16 %v101_v9, %v100_v8 }
  0x37   :  { %1242 = vmatpush3.bf16.xpose.msk.msra.mxu1 %vm1401_vm1, %v1240_v26  ;;  %1197 = vmatprep.subr.msk.bf16.mxu0 %vm1401_vm1, %v1195_v27  ;;  %v1312_v13 = vpack.c.bf16 %v115_v7, %v114_v6  ;;  %v1315_v15 = vpack.c.bf16 %v133_v11, %v132_v10  ;;  %v84_v16 = vld [vmem:[%s1963_s1 + $0x230] sm:$0xff]  ;;  %v85_v17 = vld [vmem:[%s1963_s1 + $0x238] sm:$0xff]  ;;  %v102_v20 = vld [vmem:[%s1963_s1 + $0x2c0] sm:$0xff] }
  0x38   :  { %1245 = vmatprep.subr.msk.bf16.mxu1 %vm1401_vm1, %v1243_v28  ;;  %v116_v18 = vld [vmem:[%s1963_s1 + $0x330] sm:$0xff]  ;;  %v117_v19 = vld [vmem:[%s1963_s1 + $0x338] sm:$0xff]  ;;  %v103_v21 = vld [vmem:[%s1963_s1 + $0x2c8] sm:$0xff]  ;;  %v1270_v24 = vpack.c.bf16 %v85_v17, %v84_v16 }
  0x39   :  { %v134_v22 = vld [vmem:[%s1963_s1 + $0x3c0] sm:$0xff]  ;;  %v135_v23 = vld [vmem:[%s1963_s1 + $0x3c8] sm:$0xff]  ;;  %v1318_v25 = vpack.c.bf16 %v117_v19, %v116_v18  ;;  %v1273_v26 = vpack.c.bf16 %v103_v21, %v102_v20  ;;  %v104_v32 = vld [vmem:[%s1963_s1 + $0x2d0] sm:$0xff] }
  0x3a   :  { %v1321_v27 = vpack.c.bf16 %v135_v23, %v134_v22  ;;  %v86_v28 = vld [vmem:[%s1963_s1 + $0x240] sm:$0xff]  ;;  %v87_v29 = vld [vmem:[%s1963_s1 + $0x248] sm:$0xff]  ;;  %v105_v33 = vld [vmem:[%s1963_s1 + $0x2d8] sm:$0xff] }
  0x3b   :  { %v118_v30 = vld [vmem:[%s1963_s1 + $0x340] sm:$0xff]  ;;  %v119_v31 = vld [vmem:[%s1963_s1 + $0x348] sm:$0xff]  ;;  %v136_v34 = vld [vmem:[%s1963_s1 + $0x3d0] sm:$0xff]  ;;  %v1276_v36 = vpack.c.bf16 %v87_v29, %v86_v28 }
  0x3c   :  { %v137_v35 = vld [vmem:[%s1963_s1 + $0x3d8] sm:$0xff]  ;;  %v120_v42 = vld [vmem:[%s1963_s1 + $0x350] sm:$0xff]  ;;  %v106_v44 = vld [vmem:[%s1963_s1 + $0x2e0] sm:$0xff] }
  0x3d   :  { %v89_v41 = vld [vmem:[%s1963_s1 + $0x258] sm:$0xff]  ;;  %v107_v46 = vld [vmem:[%s1963_s1 + $0x2e8] sm:$0xff]  ;;  %v138_v47 = vld [vmem:[%s1963_s1 + $0x3e0] sm:$0xff] }
  0x3e   :  { %1200 = vmatpush3.bf16.xpose.msk.msra.mxu0 %vm1401_vm1, %v1198_v37  ;;  %v1324_v37 = vpack.c.bf16 %v119_v31, %v118_v30  ;;  %v121_v43 = vld [vmem:[%s1963_s1 + $0x358] sm:$0xff]  ;;  %v139_v48 = vld [vmem:[%s1963_s1 + $0x3e8] sm:$0xff]  ;;  %v122_v56 = vld [vmem:[%s1963_s1 + $0x360] sm:$0xff] }
  0x3f   :  { %1248 = vmatpush3.bf16.xpose.msk.msra.mxu1 %vm1401_vm1, %v1246_v38  ;;  %1251 = vmatprep.subr.msk.bf16.mxu0 %vm1401_vm1, %v1249_v39  ;;  %v1279_v38 = vpack.c.bf16 %v105_v33, %v104_v32  ;;  %v1327_v39 = vpack.c.bf16 %v137_v35, %v136_v34  ;;  %v91_v55 = vld [vmem:[%s1963_s1 + $0x268] sm:$0xff]  ;;  %v108_v58 = vld [vmem:[%s1963_s1 + $0x2f0] sm:$0xff]  ;;  %v109_v59 = vld [vmem:[%s1963_s1 + $0x2f8] sm:$0xff] }
  0x40   :  { %1299 = vmatprep.subr.msk.bf16.mxu1 %vm1401_vm1, %v1297_v40  ;;  %v88_v40 = vld [vmem:[%s1963_s1 + $0x250] sm:$0xff]  ;;  %v123_v57 = vld [vmem:[%s1963_s1 + $0x368] sm:$0xff]  ;;  %v141_v61 = vld [vmem:[%s1963_s1 + $0x3f8] sm:$0xff] }
  0x41   :  { %v1282_v49 = vpack.c.bf16 %v89_v41, %v88_v40  ;;  %v140_v60 = vld [vmem:[%s1963_s1 + $0x3f0] sm:$0xff]  ;;  %v93_v3 = vld [vmem:[%s1963_s1 + $0x278] sm:$0xff] }
  0x42   :  { %v124_v5 = vld [vmem:[%s1963_s1 + $0x370] sm:$0xff]  ;;  %v125_v6 = vld [vmem:[%s1963_s1 + $0x378] sm:$0xff] }
  0x43   :  { %v1342_v8 = vpack.c.bf16 %v125_v6, %v124_v5 }
  0x45   :  { %1042 = vmatmul.mubr.msk.f32.vlgmr.msra.gmra.mrb[0].mxu0 %vm142_vm0, %v1513_v45 }
  0x46   :  { %1078 = vmatmul.mubr.msk.f32.vlgmr.msra.gmra.mrb[0].mxu1 %vm142_vm0, %v1513_v45  ;;  %1254 = vmatpush3.bf16.xpose.msk.msra.mxu0 %vm1401_vm1, %v1252_v50  ;;  %v1330_v50 = vpack.c.bf16 %v121_v43, %v120_v42 }
  0x47   :  { %1302 = vmatpush3.bf16.xpose.msk.msra.mxu1 %vm1401_vm1, %v1300_v51  ;;  %1257 = vmatprep.subr.msk.bf16.mxu0 %vm1401_vm1, %v1255_v52  ;;  %v1285_v51 = vpack.c.bf16 %v107_v46, %v106_v44  ;;  %v1333_v52 = vpack.c.bf16 %v139_v48, %v138_v47 }
  0x48   :  { %1305 = vmatprep.subr.msk.bf16.mxu1 %vm1401_vm1, %v1303_v53  ;;  %1043 = vmatprep.mubr.msk.f32.mxu0 %vm142_vm0, %v1708_v54  ;;  %v90_v53 = vld [vmem:[%s1963_s1 + $0x260] sm:$0xff] }
  0x49   :  { %1079 = vmatprep.mubr.msk.f32.mxu1 %vm142_vm0, %v1708_v54  ;;  %1044 = vmatmul.mubr.msk.f32.gmra.mrb[2].mxu0 %vm142_vm0, %v1708_v54  ;;  %v1288_v62 = vpack.c.bf16 %v91_v55, %v90_v53 }
  0x4a   :  { %1080 = vmatmul.mubr.msk.f32.gmra.mrb[2].mxu1 %vm142_vm0, %v1708_v54  ;;  %1113 = vmatprep.mubr.msk.f32.mxu0 %vm142_vm0, %v1513_v45 }
  0x4b   :  { %1149 = vmatprep.mubr.msk.f32.mxu1 %vm142_vm0, %v1513_v45 }
  0x4e   :  { %1260 = vmatpush3.bf16.xpose.msk.msra.mxu0 %vm1401_vm1, %v1258_v63  ;;  %v1336_v63 = vpack.c.bf16 %v123_v57, %v122_v56 }
  0x4f   :  { %1308 = vmatpush3.bf16.xpose.msk.msra.mxu1 %vm1401_vm1, %v1306_v0  ;;  %1263 = vmatprep.subr.msk.bf16.mxu0 %vm1401_vm1, %v1261_v1  ;;  %v1291_v0 = vpack.c.bf16 %v109_v59, %v108_v58  ;;  %v1339_v1 = vpack.c.bf16 %v141_v61, %v140_v60 }
  0x50   :  { %1311 = vmatprep.subr.msk.bf16.mxu1 %vm1401_vm1, %v1309_v2  ;;  %v92_v2 = vld [vmem:[%s1963_s1 + $0x270] sm:$0xff]  ;;  %s1372_s1 = smov [#allocation2]  }
  0x51   :  { %v1294_v7 = vpack.c.bf16 %v93_v3, %v92_v2  ;;  %s862_s13 = sshll.u32 %s1372_s1, 4  ;;  %s863_s13 = int_to_ptr.vmem [resolvable:$true] %s862_s13 }
  0x52   :  { %s1348_s14 = scalar_lea.vmem %s863_s13, 2048  ;;  %p1353_p1 = scmp.lt.s32.totalorder %s863_s13, %s863_s13 }
  0x53   :  { %p1349_p0 = scmp.ne.s32.totalorder %s863_s13, %s1348_s14  ;;  %p1354_p2 = scmp.lt.s32.totalorder %s1348_s14, %s1348_s14 }
  0x55   :  { %p1355_p3 = por %p1354_p2, %p1353_p1 }
  0x56   :  { %1266 = vmatpush3.bf16.xpose.msk.msra.mxu0 %vm1401_vm1, %v1264_v12 }
  0x57   :  { %1314 = vmatpush3.bf16.xpose.msk.msra.mxu1 %vm1401_vm1, %v1312_v13  ;;  %1269 = vmatprep.subr.msk.bf16.mxu0 %vm1401_vm1, %v1267_v14  ;;  %p1356_p4 = pnand %p1355_p3, %p1349_p0 }
  0x58   :  { %1317 = vmatprep.subr.msk.bf16.mxu1 %vm1401_vm1, %v1315_v15 }
  0x5e   :  { %1272 = vmatpush3.bf16.xpose.msk.msra.mxu0 %vm1401_vm1, %v1270_v24 }
  0x5f   :  { %1320 = vmatpush3.bf16.xpose.msk.msra.mxu1 %vm1401_vm1, %v1318_v25  ;;  %1275 = vmatprep.subr.msk.bf16.mxu0 %vm1401_vm1, %v1273_v26 }
  0x60   :  { %1323 = vmatprep.subr.msk.bf16.mxu1 %vm1401_vm1, %v1321_v27 }
  0x66   :  { %1278 = vmatpush3.bf16.xpose.msk.msra.mxu0 %vm1401_vm1, %v1276_v36 }
  0x67   :  { %1326 = vmatpush3.bf16.xpose.msk.msra.mxu1 %vm1401_vm1, %v1324_v37  ;;  %1281 = vmatprep.subr.msk.bf16.mxu0 %vm1401_vm1, %v1279_v38 }
  0x68   :  { %1329 = vmatprep.subr.msk.bf16.mxu1 %vm1401_vm1, %v1327_v39 }
  0x6e   :  { %1284 = vmatpush3.bf16.xpose.msk.msra.mxu0 %vm1401_vm1, %v1282_v49 }
  0x6f   :  { %1332 = vmatpush3.bf16.xpose.msk.msra.mxu1 %vm1401_vm1, %v1330_v50  ;;  %1287 = vmatprep.subr.msk.bf16.mxu0 %vm1401_vm1, %v1285_v51 }
  0x70   :  { %1335 = vmatprep.subr.msk.bf16.mxu1 %vm1401_vm1, %v1333_v52 }
  0x76   :  { %1290 = vmatpush3.bf16.xpose.msk.msra.mxu0 %vm1401_vm1, %v1288_v62 }
  0x77   :  { %1338 = vmatpush3.bf16.xpose.msk.msra.mxu1 %vm1401_vm1, %v1336_v63  ;;  %1293 = vmatprep.subr.msk.bf16.mxu0 %vm1401_vm1, %v1291_v0 }
  0x78   :  { %1341 = vmatprep.subr.msk.bf16.mxu1 %vm1401_vm1, %v1339_v1 }
  0x7e   :  { %1296 = vmatpush3.bf16.xpose.msk.msra.mxu0 %vm1401_vm1, %v1294_v7 }
  0x7f   :  { %1344 = vmatpush3.bf16.xpose.msk.msra.mxu1 %vm1401_vm1, %v1342_v8 }
  0x85   :  { %1114 = vmatmul.mubr.msk.f32.vlgmr.msra.gmra.mrb[4].mxu0 %vm142_vm0, %v1513_v45 }
  0x86   :  { %1150 = vmatmul.mubr.msk.f32.vlgmr.msra.gmra.mrb[4].mxu1 %vm142_vm0, %v1513_v45  ;;  %1115 = vmatprep.mubr.msk.f32.mxu0 %vm142_vm0, %v1708_v54 }
  0x87   :  { %1151 = vmatprep.mubr.msk.f32.mxu1 %vm142_vm0, %v1708_v54 }
  0x89   :  { %1116 = vmatmul.mubr.msk.f32.gmra.mrb[6].mxu0 %vm142_vm0, %v1708_v54 }
  0x8a   :  { %1152 = vmatmul.mubr.msk.f32.gmra.mrb[6].mxu1 %vm142_vm0, %v1708_v54 }
 0x118   :  { %v599_v4 = vpop.f32.mrb[0].mxu0 }
 0x119   :  { %v676_v9 = vpop.f32.mrb[0].mxu1  ;;  %841 = vst [vmem:[#allocation2] sm:$0xff] %v599_v4  ;;  %v601_v10 = vpop.f32.mrb[1].mxu0 }
 0x11a   :  { %843 = vst [vmem:[#allocation2 + $0x10] sm:$0xff] %v676_v9  ;;  %v678_v11 = vpop.f32.mrb[1].mxu1  ;;  %842 = vst [vmem:[#allocation2 + $0x8] sm:$0xff] %v601_v10 }
 0x11b   :  { %844 = vst [vmem:[#allocation2 + $0x18] sm:$0xff] %v678_v11 }
 0x11c   :  { %v605_v45 = vpop.f32.mrb[2].mxu0 }
 0x11d   :  { %v682_v12 = vpop.f32.mrb[2].mxu1  ;;  %849 = vst [vmem:[#allocation2 + $0x40] sm:$0xff] %v605_v45  ;;  %v607_v13 = vpop.f32.mrb[3].mxu0 }
 0x11e   :  { %851 = vst [vmem:[#allocation2 + $0x50] sm:$0xff] %v682_v12  ;;  %v684_v14 = vpop.f32.mrb[3].mxu1  ;;  %850 = vst [vmem:[#allocation2 + $0x48] sm:$0xff] %v607_v13 }
 0x11f   :  { %852 = vst [vmem:[#allocation2 + $0x58] sm:$0xff] %v684_v14 }
 0x158   :  { %v753_v15 = vpop.f32.mrb[4].mxu0 }
 0x159   :  { %v830_v16 = vpop.f32.mrb[4].mxu1  ;;  %845 = vst [vmem:[#allocation2 + $0x20] sm:$0xff] %v753_v15  ;;  %v755_v54 = vpop.f32.mrb[5].mxu0 }
 0x15a   :  { %847 = vst [vmem:[#allocation2 + $0x30] sm:$0xff] %v830_v16  ;;  %v832_v17 = vpop.f32.mrb[5].mxu1  ;;  %846 = vst [vmem:[#allocation2 + $0x28] sm:$0xff] %v755_v54 }
 0x15b   :  { %848 = vst [vmem:[#allocation2 + $0x38] sm:$0xff] %v832_v17 }
 0x15c   :  { %v759_v18 = vpop.f32.mrb[6].mxu0 }
 0x15d   :  { %v836_v19 = vpop.f32.mrb[6].mxu1  ;;  %853 = vst [vmem:[#allocation2 + $0x60] sm:$0xff] %v759_v18  ;;  %v761_v20 = vpop.f32.mrb[7].mxu0 }
 0x15e   :  { %855 = vst [vmem:[#allocation2 + $0x70] sm:$0xff] %v836_v19  ;;  %v838_v21 = vpop.f32.mrb[7].mxu1  ;;  %854 = vst [vmem:[#allocation2 + $0x68] sm:$0xff] %v761_v20 }
 0x15f   :  { %856 = vst [vmem:[#allocation2 + $0x78] sm:$0xff] %v838_v21 }
 0x160   :  { %1359 = shalt.err (!%p1356_p4)
}
 0x161   :  { %s1360_s17 = scalar_lea.hbm %s1964_s2, 2048 }
 0x162   :  { %p1361_p5 = scmp.ne.s32.totalorder %s1964_s2, %s1360_s17  ;;  %p1364_p6 = scmp.lt.u32.totalorder %s1360_s17, %s1964_s2 }
 0x164   :  { %p1366_p7 = pnand %p1364_p6, %p1361_p5 }
 0x166   :  { %1369 = shalt.err (!%p1366_p7)
}
 0x167   :  { %s1373_s22 = smov 1024   ;;  %s1374_s23 = smov 64  }
 0x168   :  { %868 = dma.vmem_to_hbm [thread:$0]  %s863_s13, 2048, %s1964_s2, [#allocation3], %s1373_s22, %s1373_s22, %s1374_s23  }
 0x169   :  { %1370 = dma.done.wait [#allocation3], 2048  }
 0x16a   :  { %1371 = vsyncadd [#allocation3], 4294965248 }
 0x16b   :  { %872 = vsyncpa [#allocation3], 1 }

</bundles_post_ra>
